<compile_context>
chip_gen: v7x
topology: tpu7x:2x2x1
jax: 0.10.0
libtpu: 0.0.40
codegen_flags: <defaults>
</compile_context>

<pallas_src>
import functools

import jax
import jax.numpy as jnp
from jax.experimental import pallas as pl
from jax.experimental.pallas import tpu as pltpu


def _round_up(n, m):
    return ((n + m - 1) // m) * m


def _pad2d(a, rows, cols):
    r, c = a.shape
    if r == rows and c == cols:
        return a
    return jnp.pad(a, ((0, rows - r), (0, cols - c)))


def _physical_vmem_bytes():
    """Per-generation VMEM capacity; conservative 64 MiB if the query fails."""
    try:
        info = pltpu.get_tpu_info()
        v = getattr(info, "vmem_capacity_bytes", None)
        if v:
            return int(v)
    except Exception:
        pass
    return 64 * 1024 * 1024


def _spec(shape, index_map, buffers=None):
    """BlockSpec with an optional explicit buffer count.

    Falls back to the default (double-buffered) BlockSpec if this JAX version
    does not support pipeline_mode / pl.Buffered.
    """
    if buffers is not None:
        try:
            return pl.BlockSpec(shape, index_map, pipeline_mode=pl.Buffered(buffers))
        except (AttributeError, TypeError):
            pass
    return pl.BlockSpec(shape, index_map)


def _choose_tile(n, candidates, max_waste_frac=0.125):
    """Largest candidate tile that divides n (or pads it by <= max_waste_frac)."""
    for t in candidates:
        if t > n:
            continue
        waste = _round_up(n, t) - n
        if waste == 0 or waste <= max_waste_frac * n:
            return t
    return n


# ----------------------------------------------------------------------------
# Kernels
# ----------------------------------------------------------------------------
def _kernel_resident(x_ref, w1_ref, b1_ref, w2_ref, b2_ref, emb_ref, enc_ref):
    """Fused patch-embed + embedder, W2 fully resident.  Grid: (i over M tiles).

    x_ref  : (TM, K1p)    bf16 flattened patches
    w1_ref : (K1p, Dep)   bf16 patch-embed weight   (pinned)
    b1_ref : (1, Dep)     f32
    w2_ref : (Dep, Demp)  bf16 embedder weight      (pinned, fully resident)
    b2_ref : (1, Demp)    f32
    emb_ref: (TM, Demp)   f32 inputs_embeds tile
    enc_ref: (TM, Dep)    f32 img_encoder_output tile
    """
    enc = jnp.dot(x_ref[...], w1_ref[...],
                  preferred_element_type=jnp.float32) + b1_ref[...]
    enc_ref[...] = enc.astype(enc_ref.dtype)
    emb = jnp.dot(enc.astype(jnp.bfloat16), w2_ref[...],
                  preferred_element_type=jnp.float32) + b2_ref[...]
    emb_ref[...] = emb.astype(emb_ref.dtype)


def _kernel_tiled(x_ref, w1_ref, b1_ref, w2_ref, b2_ref, emb_ref, enc_ref, enc_sc):
    """Fallback for very large D_emb: W2 streamed in TN slices.

    Grid: (i over M tiles [parallel], j over D_emb tiles [arbitrary]).
    NOTE: the enc_sc reuse requires j to stay the innermost, sequentially
    executed ("arbitrary") grid axis — do not reorder the grid or mark j
    parallel.
    """
    j = pl.program_id(1)

    @pl.when(j == 0)
    def _():
        enc = jnp.dot(x_ref[...], w1_ref[...],
                      preferred_element_type=jnp.float32) + b1_ref[...]
        enc_ref[...] = enc.astype(enc_ref.dtype)
        enc_sc[...] = enc.astype(enc_sc.dtype)

    emb = jnp.dot(enc_sc[...], w2_ref[...],
                  preferred_element_type=jnp.float32) + b2_ref[...]
    emb_ref[...] = emb.astype(emb_ref.dtype)


# ----------------------------------------------------------------------------
# Wrapper
# ----------------------------------------------------------------------------
@functools.partial(jax.jit, static_argnames=("patch_size",))
def img_processor_forward(x, conv_w, conv_b, emb_w, emb_b, *, patch_size):
    """x: (B, C, H, W) NCHW float32.  Returns (inputs_embeds, img_encoder_output)."""
    B, C, H, W = x.shape
    P = patch_size
    D_enc = conv_w.shape[0]
    D_emb = emb_w.shape[1]
    nH, nW = H // P, W // P
    N = nH * nW
    M = B * N
    K1 = C * P * P

    # --- glue: unfold patches exactly like Conv2d(kernel=P, stride=P), NCHW ---
    # Cast to bf16 *before* the full-tensor shuffle (halves HBM traffic of the
    # XLA-side transpose).
    xb = x.astype(jnp.bfloat16)
    patches = xb.reshape(B, C, nH, P, nW, P).transpose(0, 2, 4, 1, 3, 5).reshape(M, K1)
    # conv weight (D_enc, C, P, P) -> matmul weight (K1, D_enc)
    w1 = conv_w.reshape(D_enc, K1).T.astype(jnp.bfloat16)

    # --- lane/sublane alignment (zero padding does not change results) -------
    K1p = _round_up(K1, 128)
    Dep = _round_up(D_enc, 128)
    Demp = _round_up(D_emb, 128)      # pad D_emb only to 128, never to TN
    Mp8 = _round_up(M, 8)

    TM = _choose_tile(Mp8, (1024, 512, 384, 256, 128, 64, 32, 16, 8))
    # v7x megacore: make sure the "parallel" M axis has >= 2 tiles when possible.
    if Mp8 // TM <= 1 and Mp8 >= 16 and Mp8 % 16 == 0:
        TM = Mp8 // 2
    Mp = _round_up(Mp8, TM)
    grid_m = Mp // TM

    # --- choose configuration (resident W2 vs TN-tiled W2) --------------------
    budget = int(0.75 * _physical_vmem_bytes())   # ~48 MiB v7x, ~96 MiB v5e/v6e
    B1ROWS = 8                                    # (1, D) f32 blocks pad to 8 sublanes

    def need_resident(tm, wbuf):
        return (2 * tm * K1p * 2                                  # patch tile (double-buffered)
                + wbuf * (K1p * Dep * 2 + B1ROWS * Dep * 4)       # W1 + b1
                + wbuf * (Dep * Demp * 2 + B1ROWS * Demp * 4)     # W2 + b2 (resident)
                + 2 * tm * Demp * 4                               # emb out tile
                + 2 * tm * Dep * 4)                               # enc out tile

    def need_tiled(tm, tn, wbuf, w2buf):
        return (2 * tm * K1p * 2
                + wbuf * (K1p * Dep * 2 + B1ROWS * Dep * 4)
                + w2buf * (Dep * tn * 2 + B1ROWS * tn * 4)
                + 2 * tm * tn * 4
                + 2 * tm * Dep * 4
                + tm * Dep * 2)                                   # bf16 enc scratch

    use_resident, single_w, w2_buffers, TN = False, False, None, None
    need = 0
    for wbuf in (2, 1):
        if need_resident(TM, wbuf) <= budget:
            use_resident, single_w = True, (wbuf == 1)
            need = need_resident(TM, wbuf)
            break
    if not use_resident:
        TN = next(t for t in (512, 384, 256, 128) if Demp % t == 0)
        fitted = False
        for wbuf in (2, 1):
            if need_tiled(TM, TN, wbuf, 2) <= budget:
                single_w, fitted = (wbuf == 1), True
                break
        if not fitted:
            single_w = True
            while TM > 8 and need_tiled(TM, TN, 1, 2) > budget:
                TM = max(8, ((TM // 2) + 7) // 8 * 8)
            Mp = _round_up(Mp8, TM)
            grid_m = Mp // TM
        # A third W2 buffer hides the per-step W2 DMA (v6e) when VMEM allows.
        base_wbuf = 1 if single_w else 2
        w2_buffers = 3 if need_tiled(TM, TN, base_wbuf, 3) <= budget else None
        need = need_tiled(TM, TN, base_wbuf, 3 if w2_buffers else 2)

    w_buffers = 1 if single_w else None
    vmem_limit = int(min(budget, max(int(need * 1.25), 16 * 1024 * 1024)))

    # --- pad operands ---------------------------------------------------------
    patches_p = _pad2d(patches, Mp, K1p)                         # bf16
    w1_p = _pad2d(w1, K1p, Dep)                                  # bf16
    w2_p = _pad2d(emb_w.astype(jnp.bfloat16), Dep, Demp)         # bf16
    b1_p = _pad2d(conv_b.astype(jnp.float32).reshape(1, D_enc), 1, Dep)
    b2_p = _pad2d(emb_b.astype(jnp.float32).reshape(1, D_emb), 1, Demp)

    flops = 2 * Mp * (K1p * Dep + Dep * Demp)

    if use_resident:
        bytes_accessed = (Mp * K1p * 2 + K1p * Dep * 2 + Dep * Demp * 2
                          + Dep * 4 + Demp * 4 + Mp * Demp * 4 + Mp * Dep * 4)
        emb_pad, enc_pad = pl.pallas_call(
            _kernel_resident,
            out_shape=(
                jax.ShapeDtypeStruct((Mp, Demp), jnp.float32),
                jax.ShapeDtypeStruct((Mp, Dep), jnp.float32),
            ),
            grid_spec=pltpu.PrefetchScalarGridSpec(
                num_scalar_prefetch=0,
                grid=(grid_m,),
                in_specs=[
                    pl.BlockSpec((TM, K1p), lambda i: (i, 0)),              # patches
                    _spec((K1p, Dep), lambda i: (0, 0), buffers=w_buffers),  # W1 (pinned)
                    _spec((1, Dep), lambda i: (0, 0), buffers=w_buffers),    # b1
                    _spec((Dep, Demp), lambda i: (0, 0), buffers=w_buffers), # W2 (resident)
                    _spec((1, Demp), lambda i: (0, 0), buffers=w_buffers),   # b2
                ],
                out_specs=[
                    pl.BlockSpec((TM, Demp), lambda i: (i, 0)),             # inputs_embeds
                    pl.BlockSpec((TM, Dep), lambda i: (i, 0)),              # encoder output
                ],
            ),
            compiler_params=pltpu.CompilerParams(
                dimension_semantics=("parallel",),
                vmem_limit_bytes=vmem_limit),
            cost_estimate=pl.CostEstimate(flops=int(flops), transcendentals=0,
                                          bytes_accessed=int(bytes_accessed)),
        )(patches_p, w1_p, b1_p, w2_p, b2_p)
    else:
        grid_n = Demp // TN
        # W2 is re-streamed once per M tile -> count it grid_m times.
        bytes_accessed = (Mp * K1p * 2 + K1p * Dep * 2
                          + grid_m * Dep * Demp * 2
                          + Dep * 4 + grid_m * Demp * 4
                          + Mp * Demp * 4 + Mp * Dep * 4)
        emb_pad, enc_pad = pl.pallas_call(
            _kernel_tiled,
            out_shape=(
                jax.ShapeDtypeStruct((Mp, Demp), jnp.float32),
                jax.ShapeDtypeStruct((Mp, Dep), jnp.float32),
            ),
            grid_spec=pltpu.PrefetchScalarGridSpec(
                num_scalar_prefetch=0,
                grid=(grid_m, grid_n),   # j (D_emb) must stay innermost/arbitrary
                in_specs=[
                    pl.BlockSpec((TM, K1p), lambda i, j: (i, 0)),               # patches
                    _spec((K1p, Dep), lambda i, j: (0, 0), buffers=w_buffers),   # W1 (pinned)
                    _spec((1, Dep), lambda i, j: (0, 0), buffers=w_buffers),     # b1
                    _spec((Dep, TN), lambda i, j: (0, j), buffers=w2_buffers),   # W2 slice
                    pl.BlockSpec((1, TN), lambda i, j: (0, j)),                  # b2 slice
                ],
                out_specs=[
                    pl.BlockSpec((TM, TN), lambda i, j: (i, j)),                # inputs_embeds
                    pl.BlockSpec((TM, Dep), lambda i, j: (i, 0)),               # encoder output
                ],
                scratch_shapes=[pltpu.VMEM((TM, Dep), jnp.bfloat16)],
            ),
            compiler_params=pltpu.CompilerParams(
                dimension_semantics=("parallel", "arbitrary"),
                vmem_limit_bytes=vmem_limit),
            cost_estimate=pl.CostEstimate(flops=int(flops), transcendentals=0,
                                          bytes_accessed=int(bytes_accessed)),
        )(patches_p, w1_p, b1_p, w2_p, b2_p)

    inputs_embeds = emb_pad[:M, :D_emb].reshape(B, N, D_emb)
    img_encoder_output = enc_pad[:M, :D_enc].reshape(B, N, D_enc)
    return inputs_embeds, img_encoder_output


def _reference(x, conv_w, conv_b, emb_w, emb_b, patch_size):
    """Pure-JAX fp32 reference (conv via lax.conv_general_dilated, NCHW)."""
    B, C, H, W = x.shape
    P = patch_size
    D_enc = conv_w.shape[0]
    enc = jax.lax.conv_general_dilated(
        x, conv_w, window_strides=(P, P), padding="VALID",
        dimension_numbers=("NCHW", "OIHW", "NCHW"))
    enc = enc + conv_b.reshape(1, D_enc, 1, 1)
    enc = enc.reshape(B, D_enc, -1).transpose(0, 2, 1)   # (B, N, D_enc)
    emb = enc @ emb_w + emb_b.reshape(1, 1, -1)
    return emb, enc


if __name__ == "__main__":
    key = jax.random.PRNGKey(0)
    k_x, k_w1, k_b1, k_w2, k_b2 = jax.random.split(key, 5)

    # Small shapes: batch=2, channels=4, spatial=16, patch=4 -> 16 tokens.
    B, C, H, W = 2, 4, 16, 16
    P = 4
    D_enc = 32           # img_encoder hidden dim
    D_emb = 32           # word-embedding dim (from word_embeddings)

    x = jax.random.normal(k_x, (B, C, H, W), dtype=jnp.float32)
    # Deterministic synthetic parameters (no checkpoint loading).
    conv_w = 0.05 * jax.random.normal(k_w1, (D_enc, C, P, P), dtype=jnp.float32)
    conv_b = 0.01 * jax.random.normal(k_b1, (D_enc,), dtype=jnp.float32)
    emb_w = 0.05 * jax.random.normal(k_w2, (D_enc, D_emb), dtype=jnp.float32)
    emb_b = 0.01 * jax.random.normal(k_b2, (D_emb,), dtype=jnp.float32)

    inputs_embeds, img_encoder_output = img_processor_forward(
        x, conv_w, conv_b, emb_w, emb_b, patch_size=P)
    jax.block_until_ready((inputs_embeds, img_encoder_output))

    # Correctness check against pure-JAX fp32 reference (bf16 matmul inputs =>
    # looser tolerances).
    ref_emb, ref_enc = _reference(x, conv_w, conv_b, emb_w, emb_b, P)
    assert inputs_embeds.shape == (B, (H // P) * (W // P), D_emb)
    assert img_encoder_output.shape == (B, (H // P) * (W // P), D_enc)
    assert jnp.allclose(img_encoder_output, ref_enc, atol=2e-2, rtol=2e-2), (
        float(jnp.max(jnp.abs(img_encoder_output - ref_enc))))
    assert jnp.allclose(inputs_embeds, ref_emb, atol=2e-2, rtol=2e-2), (
        float(jnp.max(jnp.abs(inputs_embeds - ref_emb))))

    print("KERNEL_OK")
</pallas_src>

<mosaic_0001>
module attributes {stable_mosaic.version = 11 : i64} {
  func.func @_kernel_resident(%arg0: i32, %arg1: memref<16x128xbf16, #tpu.memory_space<vmem>>, %arg2: memref<128x128xbf16, #tpu.memory_space<vmem>>, %arg3: memref<1x128xf32, #tpu.memory_space<vmem>>, %arg4: memref<128x128xbf16, #tpu.memory_space<vmem>>, %arg5: memref<1x128xf32, #tpu.memory_space<vmem>>, %arg6: memref<16x128xf32, #tpu.memory_space<vmem>>, %arg7: memref<16x128xf32, #tpu.memory_space<vmem>>) attributes {dimension_semantics = [#tpu.dimension_semantics<parallel>], iteration_bounds = array<i64: 2>, scalar_prefetch = 0 : i64, scratch_operands = 0 : i64, tpu.core_type = #tpu.core_type<tc>, window_params = [{transform_indices = @transform_0, window_bounds = array<i64: 16, 128>}, {pipeline_mode = #tpu.pipeline_mode<synchronous>, transform_indices = @transform_1, window_bounds = array<i64: 128, 128>}, {pipeline_mode = #tpu.pipeline_mode<synchronous>, transform_indices = @transform_2, window_bounds = array<i64: 1, 128>}, {pipeline_mode = #tpu.pipeline_mode<synchronous>, transform_indices = @transform_3, window_bounds = array<i64: 128, 128>}, {pipeline_mode = #tpu.pipeline_mode<synchronous>, transform_indices = @transform_4, window_bounds = array<i64: 1, 128>}, {transform_indices = @transform_5, window_bounds = array<i64: 16, 128>}, {transform_indices = @transform_6, window_bounds = array<i64: 16, 128>}]} {
    %c0 = arith.constant 0 : index
    %c0_0 = arith.constant 0 : index
    %0 = vector.load %arg1[%c0, %c0_0] : memref<16x128xbf16, #tpu.memory_space<vmem>>, vector<16x128xbf16>
    %c0_1 = arith.constant 0 : index
    %c0_2 = arith.constant 0 : index
    %1 = vector.load %arg2[%c0_1, %c0_2] : memref<128x128xbf16, #tpu.memory_space<vmem>>, vector<128x128xbf16>
    %cst = arith.constant dense<0.000000e+00> : vector<16x128xf32>
    %2 = tpu.matmul %0, %1, %cst {dimension_numbers = #tpu.dot_dimension_numbers<[1], [0], [0], [1], [0, 0, 1, 1], [], []>} : vector<16x128xbf16>, vector<128x128xbf16>, vector<16x128xf32> -> vector<16x128xf32>
    %c0_3 = arith.constant 0 : index
    %c0_4 = arith.constant 0 : index
    %3 = vector.load %arg3[%c0_3, %c0_4] : memref<1x128xf32, #tpu.memory_space<vmem>>, vector<1x128xf32>
    %4 = vector.broadcast %3 : vector<1x128xf32> to vector<16x128xf32>
    %5 = arith.addf %2, %4 : vector<16x128xf32>
    %c0_5 = arith.constant 0 : index
    %c0_6 = arith.constant 0 : index
    %6 = vector.load %arg7[%c0_5, %c0_6] : memref<16x128xf32, #tpu.memory_space<vmem>>, vector<16x128xf32>
    tpu.vector_store %arg7[%c0_5, %c0_6], %5 {strides = array<i32>} : memref<16x128xf32, #tpu.memory_space<vmem>>, vector<16x128xf32>,
    %7 = arith.truncf %5 : vector<16x128xf32> to vector<16x128xbf16>
    %c0_7 = arith.constant 0 : index
    %c0_8 = arith.constant 0 : index
    %8 = vector.load %arg4[%c0_7, %c0_8] : memref<128x128xbf16, #tpu.memory_space<vmem>>, vector<128x128xbf16>
    %cst_9 = arith.constant dense<0.000000e+00> : vector<16x128xf32>
    %9 = tpu.matmul %7, %8, %cst_9 {dimension_numbers = #tpu.dot_dimension_numbers<[1], [0], [0], [1], [0, 0, 1, 1], [], []>} : vector<16x128xbf16>, vector<128x128xbf16>, vector<16x128xf32> -> vector<16x128xf32>
    %c0_10 = arith.constant 0 : index
    %c0_11 = arith.constant 0 : index
    %10 = vector.load %arg5[%c0_10, %c0_11] : memref<1x128xf32, #tpu.memory_space<vmem>>, vector<1x128xf32>
    %11 = vector.broadcast %10 : vector<1x128xf32> to vector<16x128xf32>
    %12 = arith.addf %9, %11 : vector<16x128xf32>
    %c0_12 = arith.constant 0 : index
    %c0_13 = arith.constant 0 : index
    %13 = vector.load %arg6[%c0_12, %c0_13] : memref<16x128xf32, #tpu.memory_space<vmem>>, vector<16x128xf32>
    tpu.vector_store %arg6[%c0_12, %c0_13], %12 {strides = array<i32>} : memref<16x128xf32, #tpu.memory_space<vmem>>, vector<16x128xf32>,
    return
  }
  func.func @transform_0(%arg0: i32) -> (i32, i32) {
    %c0_i32 = arith.constant 0 : i32
    %c0_i32_0 = arith.constant 0 : i32
    return %arg0, %c0_i32 : i32, i32
  }
  func.func @transform_1(%arg0: i32) -> (i32, i32) {
    %c0_i32 = arith.constant 0 : i32
    %c0_i32_0 = arith.constant 0 : i32
    %c0_i32_1 = arith.constant 0 : i32
    return %c0_i32, %c0_i32_0 : i32, i32
  }
  func.func @transform_2(%arg0: i32) -> (i32, i32) {
    %c0_i32 = arith.constant 0 : i32
    %c0_i32_0 = arith.constant 0 : i32
    %c0_i32_1 = arith.constant 0 : i32
    return %c0_i32, %c0_i32_0 : i32, i32
  }
  func.func @transform_3(%arg0: i32) -> (i32, i32) {
    %c0_i32 = arith.constant 0 : i32
    %c0_i32_0 = arith.constant 0 : i32
    %c0_i32_1 = arith.constant 0 : i32
    return %c0_i32, %c0_i32_0 : i32, i32
  }
  func.func @transform_4(%arg0: i32) -> (i32, i32) {
    %c0_i32 = arith.constant 0 : i32
    %c0_i32_0 = arith.constant 0 : i32
    %c0_i32_1 = arith.constant 0 : i32
    return %c0_i32, %c0_i32_0 : i32, i32
  }
  func.func @transform_5(%arg0: i32) -> (i32, i32) {
    %c0_i32 = arith.constant 0 : i32
    %c0_i32_0 = arith.constant 0 : i32
    return %arg0, %c0_i32 : i32, i32
  }
  func.func @transform_6(%arg0: i32) -> (i32, i32) {
    %c0_i32 = arith.constant 0 : i32
    %c0_i32_0 = arith.constant 0 : i32
    return %arg0, %c0_i32 : i32, i32
  }
}

</mosaic_0001>

<bundles_post_ra>
// kernel: img_processor_forward.1
= control target key start
LH: loop header
LB: loop body
LE: loop exit
PB: predicated region body
PF: predicated region fallthrough
CT: control target
= control target key end

     0   :  { %12 = vsyncpa [#allocation3], 0  ;;  %s1136_s0 = inlined_call_operand.vmem [shape: bf16[32,128], index: 0, kind: input, shape index: {}]   ;;  %s1137_s1 = inlined_call_operand.vmem [shape: bf16[128,128], index: 1, kind: input, shape index: {}]   ;;  %s1138_s2 = inlined_call_operand.vmem [shape: f32[1,128], index: 2, kind: input, shape index: {}]   ;;  %s1139_s3 = inlined_call_operand.vmem [shape: bf16[128,128], index: 3, kind: input, shape index: {}]   ;;  %s1140_s4 = inlined_call_operand.vmem [shape: f32[1,128], index: 4, kind: input, shape index: {}]   ;;  %s1141_s5 = inlined_call_operand.hbm [shape: f32[32,128], index: 5, kind: output, shape index: {0}]   ;;  %s1142_s6 = inlined_call_operand.hbm [shape: f32[32,128], index: 6, kind: output, shape index: {1}]  }
   0x1   :  { %14 = vsyncpa [#allocation3 + $0x1], 0 }
   0x2   :  { %15 = vsyncpa [#allocation5], 0 }
   0x3   :  { %17 = vsyncpa [#allocation5 + $0x1], 0  ;;  %s929_s21 = smov 0   ;;  %s931_s22 = smov 0  }
   0x4   :  { %s933_s23 = smov 0   ;;  %s935_s24 = smov 0  }
   0x5 LB: > { %s950_s25 = sadd.s32 4294967295, %s886_s24   ;;  %s632_s26 = sadd.s32 4294967294, %s886_s24   ;;  %s886_s24 = sphi %s935_s24, %s1148_s24   ;;  %s882_s23 = sphi %s933_s23, %s1147_s23   ;;  %s878_s22 = sphi %s931_s22, %s1146_s22   ;;  %s874_s21 = sphi %s929_s21, %s1145_s21  }
   0x6   : > { %s954_s27 = sadd.s32 1, %s886_s24   ;;  %s140_s28 = sadd.s32 1, %s882_s23 }
   0x7   : > { %s137_s29 = ssub.s32 %s886_s24, %s954_s27  ;;  %p150_p0 = scmp.ne.s32.totalorder %s882_s23, %s878_s22 }
   0x8   : > { %p138_p1 = scmp.eq.s32.totalorder %s137_s29, 0  ;;  %p151_p2 = scmp.eq.s32.totalorder %s950_s25, 1 }
   0x9   : > { %p156_p3 = scmp.ne.s32.totalorder %s878_s22, %s874_s21  ;;  %p157_p4 = scmp.eq.s32.totalorder %s632_s26, 1 }
   0xa   : > { %s965_s30 = scalar_select %p138_p1, %s882_s23, %s140_s28  }
   0xb   : > { %p967_p5 = por %p151_p2, %p150_p0  ;;  %p971_p6 = por %p157_p4, %p156_p3 }
   0xc   : > { %p635_p7 = scmp.ge.s32.totalorder %s886_s24, 1  ;;  %p222_p8 = scmp.lt.s32.totalorder %s886_s24, 3 }
   0xe   : > { %p223_p9 = pnand %p635_p7, %p222_p8 }
   0xf   : > { %v775_v0 = vld [vmem:[%s1137_s1] sm:$0xff] (!%p223_p9)   ;;  %v888_v1 = vmov (!%p223_p9), 0.0   ;;  %v776_v2 = vld [vmem:[%s1137_s1 + $0x8] sm:$0xff] (!%p223_p9)   ;;  %vm889_vm0 = vmmov (!%p223_p9), 0   ;;  %s638_s13 = sshll.u32 (!%p223_p9), %s950_s25, 1  ;;  %v777_v3 = vld [vmem:[%s1137_s1 + $0x10] sm:$0xff] (!%p223_p9)  }
  0x10   : > { %226 = sbr.rel (%p223_p9) target bundleno = 496 (0x1f0), region = 40  ;;  %687 = vmatprep.subr.bf16.mxu0 (!%p223_p9), %v888_v1  ;;  %707 = vmatprep.subr.bf16.mxu1 (!%p223_p9), %v888_v1  ;;  %p258_p10 = scmp.lt.s32.totalorder (!%p223_p9), %s638_s13, 3  ;;  %v784_v4 = vld [vmem:[%s1139_s3] sm:$0xff] (!%p223_p9)   ;;  %v778_v5 = vld [vmem:[%s1137_s1 + $0x18] sm:$0xff] (!%p223_p9)   ;;  %v785_v6 = vld [vmem:[%s1139_s3 + $0x8] sm:$0xff] (!%p223_p9)  }
  0x11   : > { %688 = vmatpush3.bf16.msra.mxu0 (!%p223_p9), %v775_v0  ;;  %703 = vmatprep.mubr.msk.bf16.mxu0 (!%p223_p9), %vm889_vm0, %v888_v1  ;;  %v779_v7 = vld [vmem:[%s1137_s1 + $0x20] sm:$0xff] (!%p223_p9)   ;;  %v786_v8 = vld [vmem:[%s1139_s3 + $0x10] sm:$0xff] (!%p223_p9)   ;;  %v780_v9 = vld [vmem:[%s1137_s1 + $0x28] sm:$0xff] (!%p223_p9)   ;;  %s1033_s17 = sand.u32 (!%p223_p9), 1, %s878_s22   ;;  %s667_s29 = sshll.u32 (!%p223_p9), %s950_s25, 8 }
  0x12   : > { %689 = vmatprep.subr.bf16.mxu0 (!%p223_p9), %v888_v1  ;;  %723 = vmatprep.mubr.msk.bf16.mxu1 (!%p223_p9), %vm889_vm0, %v888_v1  ;;  %v787_v10 = vld [vmem:[%s1139_s3 + $0x18] sm:$0xff] (!%p223_p9)   ;;  %v781_v11 = vld [vmem:[%s1137_s1 + $0x30] sm:$0xff] (!%p223_p9)   ;;  %v788_v12 = vld [vmem:[%s1139_s3 + $0x20] sm:$0xff] (!%p223_p9)   ;;  %s1049_s11 = scalar_lea.hbm (!%p223_p9), %s1142_s6, %s667_s29  ;;  %s509_s12 = scalar_lea.sflag (!%p223_p9), [#allocation5], %s1033_s17 }
  0x13   : > { %708 = vmatpush3.bf16.msra.mxu1 (!%p223_p9), %v784_v4  ;;  %v782_v13 = vld [vmem:[%s1137_s1 + $0x38] sm:$0xff] (!%p223_p9)   ;;  %v789_v14 = vld [vmem:[%s1139_s3 + $0x28] sm:$0xff] (!%p223_p9)   ;;  %v790_v16 = vld [vmem:[%s1139_s3 + $0x30] sm:$0xff] (!%p223_p9)   ;;  %s890_s14 = smov (!%p223_p9), [#allocation4]  }
  0x14   : > { %709 = vmatprep.subr.bf16.mxu1 (!%p223_p9), %v888_v1  ;;  %v791_v17 = vld [vmem:[%s1139_s3 + $0x38] sm:$0xff] (!%p223_p9)   ;;  %v640_v18 = vld [vmem:[%s1138_s2] ss:$0 sm:$0xff] (!%p223_p9)  ;;  %s796_s15 = sshll.u32 (!%p223_p9), %s890_s14, 4  ;;  %s797_s15 = int_to_ptr.vmem [resolvable:$false] %s796_s15 }
  0x15   : > { %690 = vmatpush3.bf16.msra.mxu0 (!%p223_p9), %v776_v2 }
  0x16   : > { %691 = vmatprep.subr.bf16.mxu0 (!%p223_p9), %v888_v1 }
  0x17   : > { %s1150_s13 = smov (!%p258_p10, %s638_s13), 3  ;;  %710 = vmatpush3.bf16.msra.mxu1 %v785_v6 }
  0x18   : > { %s639_s16 = sshll.u32 %s1150_s13, 2  ;;  %711 = vmatprep.subr.bf16.mxu1 %v888_v1 }
  0x19   : > { %s990_s19 = scalar_lea.vmem %s1136_s0, %s639_s16  ;;  %692 = vmatpush3.bf16.msra.mxu0 %v777_v3  ;;  %s798_s16 = scalar_lea.vmem %s797_s15, 512 }
  0x1a   : > { %693 = vmatprep.subr.bf16.mxu0 %v888_v1  ;;  %v783_v15 = vld [vmem:[%s990_s19] sm:$0xff]   ;;  %s636_s19 = sshll.u32 %s1033_s17, 4 }
  0x1b   : > { %712 = vmatpush3.bf16.msra.mxu1 %v786_v8  ;;  %s256_s26 = scalar_lea.vmem [#allocation4], %s636_s19 }
  0x1c   : > { %713 = vmatprep.subr.bf16.mxu1 %v888_v1  ;;  %s538_s28 = sshll.u32 %s256_s26, 4  ;;  %s1041_s28 = int_to_ptr.vmem [resolvable:$true] %s538_s28 }
  0x1d   : > { %694 = vmatpush3.bf16.msra.mxu0 %v778_v5  ;;  %s792_s13 = scalar_lea.vmem %s1041_s28, 256  ;;  %p799_p0 = scmp.lt.s32.totalorder %s1041_s28, %s797_s15 }
  0x1e   : > { %695 = vmatprep.subr.bf16.mxu0 %v888_v1  ;;  %p793_p11 = scmp.ne.s32.totalorder %s1041_s28, %s792_s13  ;;  %p800_p1 = scmp.lt.s32.totalorder %s798_s16, %s792_s13 }
  0x1f   : > { %714 = vmatpush3.bf16.msra.mxu1 %v787_v10 }
  0x20   : > { %715 = vmatprep.subr.bf16.mxu1 %v888_v1  ;;  %p794_p12 = pnand %p793_p11, %p967_p5  ;;  %p801_p2 = por %p800_p1, %p799_p0 }
  0x21   : > { %696 = vmatpush3.bf16.msra.mxu0 %v779_v7 }
  0x22   : > { %697 = vmatprep.subr.bf16.mxu0 %v888_v1  ;;  %p795_p13 = pneg %p794_p12 }
  0x23   : > { %716 = vmatpush3.bf16.msra.mxu1 %v788_v12 }
  0x24   : > { %717 = vmatprep.subr.bf16.mxu1 %v888_v1  ;;  %p802_p3 = pnand %p801_p2, %p795_p13 }
  0x25   : > { %698 = vmatpush3.bf16.msra.mxu0 %v780_v9 }
  0x26   : > { %699 = vmatprep.subr.bf16.mxu0 %v888_v1 }
  0x27   : > { %718 = vmatpush3.bf16.msra.mxu1 %v789_v14 }
  0x28   : > { %719 = vmatprep.subr.bf16.mxu1 %v888_v1 }
  0x29   : > { %700 = vmatpush3.bf16.msra.mxu0 %v781_v11 }
  0x2a   : > { %701 = vmatprep.subr.bf16.mxu0 %v888_v1 }
  0x2b   : > { %720 = vmatpush3.bf16.msra.mxu1 %v790_v16 }
  0x2c   : > { %721 = vmatprep.subr.bf16.mxu1 %v888_v1 }
  0x2d   : > { %702 = vmatpush3.bf16.msra.mxu0 %v782_v13 }
  0x2f   : > { %722 = vmatpush3.bf16.msra.mxu1 %v791_v17 }
  0x30   : > { %704 = vmatmul.mubr.bf16.vlgmr.msra.gmra.mrb[0].mxu0 %v783_v15 }
 0x103   : > { %v379_v19 = vpop.f32.mrb[0].mxu0 }
 0x104   : > { %v380_v20 = vadd.f32 %v640_v18, %v379_v19  ;;  %v705_v21 = vpop.f32.mrb[1].mxu0 }
 0x105   : > { %v382_v22 = vpop.f32.mrb[2].mxu0 }
 0x106   : > { %386 = vst [vmem:[%s256_s26] sm:$0xff] %v380_v20  ;;  %v383_v23 = vadd.f32 %v640_v18, %v382_v22  ;;  %v706_v24 = vpop.f32.mrb[3].mxu0 }
 0x108   : > { %387 = vst [vmem:[%s256_s26 + $0x8] sm:$0xff] %v383_v23  ;;  %v388_v25 = vpack.c.bf16 %v383_v23, %v380_v20 }
 0x10a   : > { %724 = vmatmul.mubr.bf16.vlgmr.msra.gmra.mrb[0].mxu1 %v388_v25 }
 0x10b   : > { %805 = shalt.err (!%p802_p3)
}
 0x10c   : > { %s806_s18 = scalar_lea.hbm %s1049_s11, 256  ;;  %s810_s9 = scalar_lea.hbm %s1142_s6, 512 }
 0x10d   : > { %p807_p4 = scmp.ne.s32.totalorder %s1049_s11, %s806_s18  ;;  %p811_p9 = scmp.lt.u32.totalorder %s1049_s11, %s1142_s6 }
 0x10e   : > { %p812_p10 = scmp.lt.u32.totalorder %s810_s9, %s806_s18  ;;  %p814_p12 = scmp.lt.u32.totalorder %s806_s18, %s1049_s11 }
 0x10f   : > { %p808_p7 = pnand %p807_p4, %p967_p5 }
 0x110   : > { %p813_p11 = por %p812_p10, %p811_p9 }
 0x111   : > { %p809_p8 = pneg %p808_p7 }
 0x112   : > { %p815_p13 = por %p814_p12, %p813_p11 }
 0x114   : > { %p816_p0 = pnand %p815_p13, %p809_p8 }
 0x116   : > { %819 = shalt.err (!%p816_p0)
}
 0x117   : > { %s891_s13 = smov 128   ;;  %s892_s15 = smov 8   ;;  %v650_v26 = vld [vmem:[%s1140_s4] ss:$0 sm:$0xff] }
 0x118   : > { %728 = dma.vmem_to_hbm [thread:$0]  (%p967_p5), %s1041_s28, 256, %s1049_s11, %s509_s12, %s891_s13, %s891_s13, %s892_s15  }
 0x119   : > { %s249_s20 = scalar_lea.vmem [#allocation2], %s636_s19  ;;  %s1090_s12 = scalar_lea.hbm %s1141_s5, %s667_s29 }
 0x11a   : > { %s522_s26 = sshll.u32 %s249_s20, 4  ;;  %s504_s19 = scalar_lea.sflag [#allocation3], %s1033_s17  ;;  %s1083_s26 = int_to_ptr.vmem [resolvable:$true] %s522_s26 }
 0x11b   : > { %s820_s9 = scalar_lea.vmem %s1083_s26, 256  ;;  %s893_s10 = smov [#allocation2]  }
 0x11c   : > { %p821_p1 = scmp.ne.s32.totalorder %s1083_s26, %s820_s9  ;;  %s824_s14 = sshll.u32 %s893_s10, 4  ;;  %s825_s14 = int_to_ptr.vmem [resolvable:$false] %s824_s14 }
 0x11d   : > { %s826_s16 = scalar_lea.vmem %s825_s14, 512  ;;  %p827_p4 = scmp.lt.s32.totalorder %s1083_s26, %s825_s14 }
 0x11e   : > { %p822_p2 = pnand %p821_p1, %p967_p5  ;;  %p828_p7 = scmp.lt.s32.totalorder %s826_s16, %s820_s9 }
 0x120   : > { %p823_p3 = pneg %p822_p2  ;;  %p829_p8 = por %p828_p7, %p827_p4 }
 0x122   : > { %p830_p9 = pnand %p829_p8, %p823_p3 }
 0x1dd   : > { %v494_v27 = vpop.f32.mrb[0].mxu1 }
 0x1de   : > { %v495_v28 = vadd.f32 %v650_v26, %v494_v27  ;;  %v725_v29 = vpop.f32.mrb[1].mxu1 }
 0x1df   : > { %v497_v30 = vpop.f32.mrb[2].mxu1 }
 0x1e0   : > { %501 = vst [vmem:[%s249_s20] sm:$0xff] %v495_v28  ;;  %v498_v31 = vadd.f32 %v650_v26, %v497_v30  ;;  %v726_v32 = vpop.f32.mrb[3].mxu1 }
 0x1e2   : > { %502 = vst [vmem:[%s249_s20 + $0x8] sm:$0xff] %v498_v31 }
 0x1e3   : > { %833 = shalt.err (!%p830_p9)
}
 0x1e4   : > { %s834_s25 = scalar_lea.hbm %s1090_s12, 256  ;;  %s838_s20 = scalar_lea.hbm %s1141_s5, 512 }
 0x1e5   : > { %p835_p10 = scmp.ne.s32.totalorder %s1090_s12, %s834_s25  ;;  %p839_p13 = scmp.lt.u32.totalorder %s1090_s12, %s1141_s5 }
 0x1e6   : > { %p840_p0 = scmp.lt.u32.totalorder %s838_s20, %s834_s25  ;;  %p842_p2 = scmp.lt.u32.totalorder %s834_s25, %s1090_s12 }
 0x1e7   : > { %p836_p11 = pnand %p835_p10, %p967_p5 }
 0x1e8   : > { %p841_p1 = por %p840_p0, %p839_p13 }
 0x1e9   : > { %p837_p12 = pneg %p836_p11 }
 0x1ea   : > { %p843_p3 = por %p842_p2, %p841_p1 }
 0x1ec   : > { %p844_p4 = pnand %p843_p3, %p837_p12 }
 0x1ee   : > { %847 = shalt.err (!%p844_p4)
}
 0x1ef   : > { %727 = dma.vmem_to_hbm [thread:$0]  (%p967_p5), %s1083_s26, 256, %s1090_s12, %s504_s19, %s891_s13, %s891_s13, %s892_s15  }
 0x1f0 PF: > { %p738_p7 = scmp.ge.s32.totalorder %s886_s24, 2  ;;  %s553_s9 = sand.u32 1, %s874_s21  }
 0x1f1   : > { %s554_s10 = scalar_lea.sflag [#allocation3], %s553_s9 }
 0x1f2   : > { %p732_p8 = pnand %p738_p7, %p971_p6 }
 0x1f4   : > { %865 = dma.done.wait (!%p732_p8), %s554_s10, 256  }
 0x1f5   : > { %867 = vsyncadd (!%p732_p8), %s554_s10, 4294967040  ;;  %s563_s7 = scalar_lea.sflag [#allocation5], %s553_s9 }
 0x1f6   : > { %869 = dma.done.wait (!%p732_p8), %s563_s7, 256  }
 0x1f7   : > { %871 = vsyncadd (!%p732_p8), %s563_s7, 4294967040  ;;  %p20_p5 = scmp.ge.s32.totalorder %s954_s27, 4   ;;  %s1145_s21 = smov %s878_s22 }
 0x1f8   : > { %s1146_s22 = smov %s882_s23  ;;  %s1147_s23 = smov %s965_s30 }
 0x1f9   : > { %s1148_s24 = smov %s954_s27  ;;  %22 = sbr.rel (!%p20_p5) target bundleno = 5 (0x5), region = 92 }
 0x200   :  { %568 = vsyncpa [#allocation3], 1 }
 0x201   :  { %570 = vsyncpa [#allocation3 + $0x1], 1 }
 0x202   :  { %571 = vsyncpa [#allocation5], 1 }
 0x203   :  { %573 = vsyncpa [#allocation5 + $0x1], 1 }

</bundles_post_ra>
